<compile_context>
chip_gen: v7x
topology: tpu7x:2x2x1
jax: 0.10.0
libtpu: 0.0.40
codegen_flags: <defaults>
</compile_context>

<pallas_src>
import functools

import jax
import jax.numpy as jnp
from jax import lax
from jax.experimental import pallas as pl
from jax.experimental.pallas import tpu as pltpu


_LANE = 128
_VMEM_LIMIT_BYTES = 48 * 1024 * 1024  # fits v7x's 64 MiB physical VMEM with headroom


def _leaky_relu(x, slope):
    # slope in (0, 1) -> max(x, slope*x) == LeakyReLU(slope)
    return jnp.maximum(x, slope * x)


def _pick_tile_hw(hw_lane_aligned):
    """Largest lane-aligned spatial tile that fits the generation's VMEM."""
    try:
        vmem = pltpu.get_tpu_info().vmem_capacity_bytes
    except Exception:
        vmem = 64 * 1024 * 1024
    # v5e/v6e (128 MiB VMEM) take a 2x larger tile than v7x (64 MiB).
    max_tile = 8192 if vmem >= 128 * 1024 * 1024 else 4096
    return min(hw_lane_aligned, max_tile)


# --------------------- pass 1: per-tile InstanceNorm statistics ---------------------
def _stats_kernel(x_ref, w1_ref, b1_ref, w2_ref, b2_ref, stats_ref, *,
                  slope, valid_hw, compute_dtype):
    tile_hw = x_ref.shape[2]
    x = x_ref[0].astype(compute_dtype)                                  # (Cin, T)

    # conv1 + conv2 on the MXU (f32 accumulation), bias folded in directly.
    h1 = jnp.dot(w1_ref[...], x, preferred_element_type=jnp.float32) + b1_ref[...]
    a1 = _leaky_relu(h1, slope).astype(compute_dtype)                   # (ndf, T)
    h2 = jnp.dot(w2_ref[...], a1, preferred_element_type=jnp.float32) + b2_ref[...]

    if valid_hw is not None:  # ragged last tile: keep padded pixels out of the stats
        col = lax.broadcasted_iota(jnp.int32, (1, tile_hw), 1) \
            + pl.program_id(1) * tile_hw
        h2 = jnp.where(col < valid_hw, h2, 0.0)

    # one-pass stats (single sweep of h2), kept in f32
    s = jnp.sum(h2, axis=-1, keepdims=True)                             # (2*ndf, 1)
    ss = jnp.sum(h2 * h2, axis=-1, keepdims=True)                       # (2*ndf, 1)
    stats_ref[0, 0] = jnp.concatenate([s, ss], axis=-1)                 # (2*ndf, 2)


# --------------------- pass 2: normalize + LeakyReLU + conv3 ------------------------
def _forward_kernel(x_ref, w1_ref, b1_ref, w2_ref, b2_ref,
                    sc_ref, sh_ref, w3_ref, b3_ref, o_ref, *,
                    slope, compute_dtype):
    x = x_ref[0].astype(compute_dtype)                                  # (Cin, T)
    h1 = jnp.dot(w1_ref[...], x, preferred_element_type=jnp.float32) + b1_ref[...]
    a1 = _leaky_relu(h1, slope).astype(compute_dtype)
    h2 = jnp.dot(w2_ref[...], a1, preferred_element_type=jnp.float32) + b2_ref[...]

    # InstanceNorm(affine=False) folded to one FMA with precomputed f32 coefficients.
    h2n = h2 * sc_ref[0] + sh_ref[0]                                    # (2*ndf, T)
    a2 = _leaky_relu(h2n, slope).astype(compute_dtype)

    # conv3 as an MXU matmul -> lane-dense (1, T) result.
    h3 = jnp.dot(w3_ref[...], a2, preferred_element_type=jnp.float32) + b3_ref[...]
    o_ref[0] = h3.astype(o_ref.dtype)


def pixel_discriminator(x, w1, b1, w2, b2, w3, b3, *,
                        negative_slope=0.2, eps=1e-5,
                        compute_dtype=jnp.float32, tile_hw=None):
    """Pallas equivalent of Define_D(netD='pixel').forward.

    x  : (N, Cin, H, W)
    w1 : (Cin, ndf)      b1 : (ndf,)
    w2 : (ndf, 2*ndf)    b2 : (2*ndf,)
    w3 : (2*ndf,)        b3 : (1,)
    returns (N, 1, H, W) float32
    """
    n, cin, h, w = x.shape
    hw = h * w
    ndf = w1.shape[1]
    ndf2 = w2.shape[1]

    hw_128 = ((hw + _LANE - 1) // _LANE) * _LANE
    if tile_hw is None:
        tile_hw = _pick_tile_hw(hw_128)
    tile_hw = min(tile_hw, hw_128)
    hw_pad = ((hw_128 + tile_hw - 1) // tile_hw) * tile_hw
    n_tiles = hw_pad // tile_hw

    # channels-on-sublanes / pixels-on-lanes: NCHW -> (N, Cin, HW) is a pure reshape.
    x_rows = x.reshape(n, cin, hw).astype(jnp.float32)
    if hw_pad != hw:
        x_rows = jnp.pad(x_rows, ((0, 0), (0, 0), (0, hw_pad - hw)))

    cd = compute_dtype
    w1t = jnp.asarray(w1, jnp.float32).T.astype(cd)                     # (ndf, Cin)
    w2t = jnp.asarray(w2, jnp.float32).T.astype(cd)                     # (2*ndf, ndf)
    w3r = jnp.asarray(w3, jnp.float32).reshape(1, ndf2).astype(cd)      # (1, 2*ndf)
    b1c = jnp.asarray(b1, jnp.float32).reshape(ndf, 1)
    b2c = jnp.asarray(b2, jnp.float32).reshape(ndf2, 1)
    b3c = jnp.asarray(b3, jnp.float32).reshape(1, 1)

    cparams = pltpu.CompilerParams(
        dimension_semantics=("parallel", "parallel"),
        vmem_limit_bytes=_VMEM_LIMIT_BYTES)

    def weight_spec(shape):
        return pl.BlockSpec(shape, lambda i, t: (0, 0))

    # ---- pass 1: per-(image, channel) sum / sum-of-squares of h2 ----
    stats = pl.pallas_call(
        functools.partial(_stats_kernel, slope=negative_slope,
                          valid_hw=(hw if hw_pad != hw else None),
                          compute_dtype=cd),
        out_shape=jax.ShapeDtypeStruct((n, n_tiles, ndf2, 2), jnp.float32),
        grid_spec=pltpu.PrefetchScalarGridSpec(
            num_scalar_prefetch=0,
            grid=(n, n_tiles),
            in_specs=[
                pl.BlockSpec((1, cin, tile_hw), lambda i, t: (i, 0, t)),
                weight_spec((ndf, cin)),
                weight_spec((ndf, 1)),
                weight_spec((ndf2, ndf)),
                weight_spec((ndf2, 1)),
            ],
            out_specs=pl.BlockSpec((1, 1, ndf2, 2), lambda i, t: (i, t, 0, 0)),
        ),
        compiler_params=cparams,
    )(x_rows, w1t, b1c, w2t, b2c)

    # tiny cross-tile reduction + coefficient computation (plain JAX, f32)
    s = jnp.sum(stats[..., 0], axis=1)                                  # (N, 2*ndf)
    ss = jnp.sum(stats[..., 1], axis=1)
    mu = s / hw
    var = jnp.maximum(ss / hw - mu * mu, 0.0)   # one-pass stats, f32 accumulators
    inv_std = lax.rsqrt(var + eps)
    scale = inv_std.reshape(n, ndf2, 1)
    shift = (-mu * inv_std).reshape(n, ndf2, 1)

    # ---- pass 2: recompute conv1/conv2, normalize, LeakyReLU, conv3 ----
    out = pl.pallas_call(
        functools.partial(_forward_kernel, slope=negative_slope, compute_dtype=cd),
        out_shape=jax.ShapeDtypeStruct((n, 1, hw_pad), jnp.float32),
        grid_spec=pltpu.PrefetchScalarGridSpec(
            num_scalar_prefetch=0,
            grid=(n, n_tiles),
            in_specs=[
                pl.BlockSpec((1, cin, tile_hw), lambda i, t: (i, 0, t)),
                weight_spec((ndf, cin)),
                weight_spec((ndf, 1)),
                weight_spec((ndf2, ndf)),
                weight_spec((ndf2, 1)),
                pl.BlockSpec((1, ndf2, 1), lambda i, t: (i, 0, 0)),
                pl.BlockSpec((1, ndf2, 1), lambda i, t: (i, 0, 0)),
                weight_spec((1, ndf2)),
                weight_spec((1, 1)),
            ],
            out_specs=pl.BlockSpec((1, 1, tile_hw), lambda i, t: (i, 0, t)),
        ),
        compiler_params=cparams,
    )(x_rows, w1t, b1c, w2t, b2c, scale, shift, w3r, b3c)

    return out[:, :, :hw].reshape(n, 1, h, w)


def pixel_discriminator_ref(x, w1, b1, w2, b2, w3, b3, *,
                            negative_slope=0.2, eps=1e-5):
    """Pure-JAX reference for the PixelDiscriminator forward."""
    n, cin, h, w = x.shape
    xr = jnp.transpose(x, (0, 2, 3, 1)).reshape(n, h * w, cin).astype(jnp.float32)
    h1 = xr @ w1 + b1
    a1 = jnp.maximum(h1, negative_slope * h1)
    h2 = a1 @ w2 + b2
    mu = jnp.mean(h2, axis=1, keepdims=True)
    var = jnp.mean(jnp.square(h2 - mu), axis=1, keepdims=True)
    h2n = (h2 - mu) * lax.rsqrt(var + eps)
    a2 = jnp.maximum(h2n, negative_slope * h2n)
    h3 = a2 @ w3.reshape(-1, 1) + b3.reshape(1, 1)
    return h3.reshape(n, h, w)[:, None, :, :]


if __name__ == "__main__":
    key = jax.random.PRNGKey(0)
    kx, k1, k2, k3, kb1, kb2 = jax.random.split(key, 6)

    # ---- Define_D('pixel') forward: NCHW input (2, 4, 16, 16), ndf = 64 ----
    N, CIN, H, W = 2, 4, 16, 16
    NDF = 64
    x = jax.random.normal(kx, (N, CIN, H, W), dtype=jnp.float32)

    init_gain = 0.02  # init_type='normal', init_gain=0.02; biases init to 0
    w1 = init_gain * jax.random.normal(k1, (CIN, NDF), dtype=jnp.float32)
    b1 = jnp.zeros((NDF,), jnp.float32)
    w2 = init_gain * jax.random.normal(k2, (NDF, 2 * NDF), dtype=jnp.float32)
    b2 = jnp.zeros((2 * NDF,), jnp.float32)
    w3 = init_gain * jax.random.normal(k3, (2 * NDF,), dtype=jnp.float32)
    b3 = jnp.zeros((1,), jnp.float32)

    ref = pixel_discriminator_ref(x, w1, b1, w2, b2, w3, b3)

    # f32 path (exact vs reference)
    out = jax.block_until_ready(pixel_discriminator(x, w1, b1, w2, b2, w3, b3))
    assert out.shape == (N, 1, H, W), out.shape
    assert jnp.allclose(out, ref, rtol=1e-3, atol=1e-4), float(
        jnp.max(jnp.abs(out - ref)))

    # bf16-matmul fast path (v6e/v7x knob); stats/normalization stay f32.
    out_bf16 = jax.block_until_ready(
        pixel_discriminator(x, w1, b1, w2, b2, w3, b3,
                            compute_dtype=jnp.bfloat16))
    rel = jnp.linalg.norm(out_bf16 - ref) / jnp.linalg.norm(ref)
    assert out_bf16.shape == (N, 1, H, W)
    assert float(rel) < 0.15, float(rel)

    # multi-tile spatial path (forces 2 HW tiles at this small size)
    out_tiled = jax.block_until_ready(
        pixel_discriminator(x, w1, b1, w2, b2, w3, b3, tile_hw=128))
    assert jnp.allclose(out_tiled, ref, rtol=1e-3, atol=1e-4), float(
        jnp.max(jnp.abs(out_tiled - ref)))

    # ragged spatial extent (HW=100 padded to 128) with nonzero biases so the
    # in-kernel stat masking is actually exercised.
    x2 = jax.random.normal(kx, (1, CIN, 10, 10), dtype=jnp.float32)
    b1n = 0.05 * jax.random.normal(kb1, (NDF,), dtype=jnp.float32)
    b2n = 0.05 * jax.random.normal(kb2, (2 * NDF,), dtype=jnp.float32)
    ref2 = pixel_discriminator_ref(x2, w1, b1n, w2, b2n, w3, b3)
    out2 = jax.block_until_ready(
        pixel_discriminator(x2, w1, b1n, w2, b2n, w3, b3, tile_hw=128))
    assert out2.shape == (1, 1, 10, 10), out2.shape
    assert jnp.allclose(out2, ref2, rtol=1e-3, atol=1e-4), float(
        jnp.max(jnp.abs(out2 - ref2)))

    print("KERNEL_OK")
</pallas_src>

<mosaic_0001>
module attributes {stable_mosaic.version = 11 : i64} {
  func.func @_stats_kernel(%arg0: i32, %arg1: i32, %arg2: memref<1x4x256xf32, #tpu.memory_space<vmem>>, %arg3: memref<64x4xf32, #tpu.memory_space<vmem>>, %arg4: memref<64x1xf32, #tpu.memory_space<vmem>>, %arg5: memref<128x64xf32, #tpu.memory_space<vmem>>, %arg6: memref<128x1xf32, #tpu.memory_space<vmem>>, %arg7: memref<1x1x128x2xf32, #tpu.memory_space<vmem>>) attributes {dimension_semantics = [#tpu.dimension_semantics<parallel>, #tpu.dimension_semantics<parallel>], iteration_bounds = array<i64: 2, 1>, scalar_prefetch = 0 : i64, scratch_operands = 0 : i64, tpu.core_type = #tpu.core_type<tc>, window_params = [{transform_indices = @transform_0, window_bounds = array<i64: 1, 4, 256>}, {pipeline_mode = #tpu.pipeline_mode<synchronous>, transform_indices = @transform_1, window_bounds = array<i64: 64, 4>}, {pipeline_mode = #tpu.pipeline_mode<synchronous>, transform_indices = @transform_2, window_bounds = array<i64: 64, 1>}, {pipeline_mode = #tpu.pipeline_mode<synchronous>, transform_indices = @transform_3, window_bounds = array<i64: 128, 64>}, {pipeline_mode = #tpu.pipeline_mode<synchronous>, transform_indices = @transform_4, window_bounds = array<i64: 128, 1>}, {transform_indices = @transform_5, window_bounds = array<i64: 1, 1, 128, 2>}]} {
    %c0 = arith.constant 0 : index
    %c0_0 = arith.constant 0 : index
    %c0_1 = arith.constant 0 : index
    %0 = vector.load %arg2[%c0, %c0_0, %c0_1] : memref<1x4x256xf32, #tpu.memory_space<vmem>>, vector<1x4x256xf32>
    %1 = vector.shape_cast %0 : vector<1x4x256xf32> to vector<4x256xf32>
    %c0_2 = arith.constant 0 : index
    %c0_3 = arith.constant 0 : index
    %2 = vector.load %arg3[%c0_2, %c0_3] : memref<64x4xf32, #tpu.memory_space<vmem>>, vector<64x4xf32>
    %cst = arith.constant dense<0.000000e+00> : vector<64x256xf32>
    %3 = tpu.matmul %2, %1, %cst {dimension_numbers = #tpu.dot_dimension_numbers<[1], [0], [0], [1], [0, 0, 1, 1], [], []>} : vector<64x4xf32>, vector<4x256xf32>, vector<64x256xf32> -> vector<64x256xf32>
    %c0_4 = arith.constant 0 : index
    %c0_5 = arith.constant 0 : index
    %4 = vector.load %arg4[%c0_4, %c0_5] : memref<64x1xf32, #tpu.memory_space<vmem>>, vector<64x1xf32>
    %5 = vector.broadcast %4 : vector<64x1xf32> to vector<64x256xf32>
    %6 = arith.addf %3, %5 : vector<64x256xf32>
    %cst_6 = arith.constant 2.000000e-01 : f32
    %7 = vector.broadcast %cst_6 : f32 to vector<64x256xf32>
    %8 = arith.mulf %7, %6 : vector<64x256xf32>
    %9 = arith.maximumf %6, %8 : vector<64x256xf32>
    %c0_7 = arith.constant 0 : index
    %c0_8 = arith.constant 0 : index
    %10 = vector.load %arg5[%c0_7, %c0_8] : memref<128x64xf32, #tpu.memory_space<vmem>>, vector<128x64xf32>
    %cst_9 = arith.constant dense<0.000000e+00> : vector<128x256xf32>
    %11 = tpu.matmul %10, %9, %cst_9 {dimension_numbers = #tpu.dot_dimension_numbers<[1], [0], [0], [1], [0, 0, 1, 1], [], []>} : vector<128x64xf32>, vector<64x256xf32>, vector<128x256xf32> -> vector<128x256xf32>
    %c0_10 = arith.constant 0 : index
    %c0_11 = arith.constant 0 : index
    %12 = vector.load %arg6[%c0_10, %c0_11] : memref<128x1xf32, #tpu.memory_space<vmem>>, vector<128x1xf32>
    %13 = vector.broadcast %12 : vector<128x1xf32> to vector<128x256xf32>
    %14 = arith.addf %11, %13 : vector<128x256xf32>
    %cst_12 = arith.constant dense<0.000000e+00> : vector<128xf32>
    %15 = vector.multi_reduction <add>, %14, %cst_12 [1] : vector<128x256xf32> to vector<128xf32>
    %16 = vector.shape_cast %15 : vector<128xf32> to vector<128x1xf32>
    %17 = arith.mulf %14, %14 : vector<128x256xf32>
    %cst_13 = arith.constant dense<0.000000e+00> : vector<128xf32>
    %18 = vector.multi_reduction <add>, %17, %cst_13 [1] : vector<128x256xf32> to vector<128xf32>
    %19 = vector.shape_cast %18 : vector<128xf32> to vector<128x1xf32>
    %20 = tpu.concatenate %16, %19 in 1 : vector<128x1xf32>, vector<128x1xf32> -> vector<128x2xf32>
    %c0_14 = arith.constant 0 : index
    %c0_15 = arith.constant 0 : index
    %c0_16 = arith.constant 0 : index
    %c0_17 = arith.constant 0 : index
    %21 = vector.load %arg7[%c0_14, %c0_15, %c0_16, %c0_17] : memref<1x1x128x2xf32, #tpu.memory_space<vmem>>, vector<1x1x128x2xf32>
    %22 = vector.shape_cast %21 : vector<1x1x128x2xf32> to vector<128x2xf32>
    %23 = vector.shape_cast %20 : vector<128x2xf32> to vector<1x1x128x2xf32>
    tpu.vector_store %arg7[%c0_14, %c0_15, %c0_16, %c0_17], %23 {strides = array<i32>} : memref<1x1x128x2xf32, #tpu.memory_space<vmem>>, vector<1x1x128x2xf32>,
    return
  }
  func.func @transform_0(%arg0: i32, %arg1: i32) -> (i32, i32, i32) {
    %c0_i32 = arith.constant 0 : i32
    %c0_i32_0 = arith.constant 0 : i32
    return %arg0, %c0_i32, %arg1 : i32, i32, i32
  }
  func.func @transform_1(%arg0: i32, %arg1: i32) -> (i32, i32) {
    %c0_i32 = arith.constant 0 : i32
    %c0_i32_0 = arith.constant 0 : i32
    %c0_i32_1 = arith.constant 0 : i32
    return %c0_i32, %c0_i32_0 : i32, i32
  }
  func.func @transform_2(%arg0: i32, %arg1: i32) -> (i32, i32) {
    %c0_i32 = arith.constant 0 : i32
    %c0_i32_0 = arith.constant 0 : i32
    %c0_i32_1 = arith.constant 0 : i32
    return %c0_i32, %c0_i32_0 : i32, i32
  }
  func.func @transform_3(%arg0: i32, %arg1: i32) -> (i32, i32) {
    %c0_i32 = arith.constant 0 : i32
    %c0_i32_0 = arith.constant 0 : i32
    %c0_i32_1 = arith.constant 0 : i32
    return %c0_i32, %c0_i32_0 : i32, i32
  }
  func.func @transform_4(%arg0: i32, %arg1: i32) -> (i32, i32) {
    %c0_i32 = arith.constant 0 : i32
    %c0_i32_0 = arith.constant 0 : i32
    %c0_i32_1 = arith.constant 0 : i32
    return %c0_i32, %c0_i32_0 : i32, i32
  }
  func.func @transform_5(%arg0: i32, %arg1: i32) -> (i32, i32, i32, i32) {
    %c0_i32 = arith.constant 0 : i32
    %c0_i32_0 = arith.constant 0 : i32
    %c0_i32_1 = arith.constant 0 : i32
    return %arg0, %arg1, %c0_i32, %c0_i32_0 : i32, i32, i32, i32
  }
}

</mosaic_0001>

<bundles_post_ra>
// kernel: tpu_custom_call.1
= control target key start
LH: loop header
LB: loop body
LE: loop exit
PB: predicated region body
PF: predicated region fallthrough
CT: control target
= control target key end

     0   :  { %s1218_s18 = smov 0   ;;  %s1220_s19 = smov 0   ;;  %s1501_s0 = inlined_call_operand.vmem [shape: f32[2,4,256], index: 0, kind: input, shape index: {}]   ;;  %s1502_s1 = inlined_call_operand.vmem [shape: f32[64,4], index: 1, kind: input, shape index: {}]   ;;  %s1503_s2 = inlined_call_operand.vmem [shape: f32[64,1], index: 2, kind: input, shape index: {}]   ;;  %s1504_s3 = inlined_call_operand.vmem [shape: f32[128,64], index: 3, kind: input, shape index: {}]   ;;  %s1505_s4 = inlined_call_operand.vmem [shape: f32[128,1], index: 4, kind: input, shape index: {}]   ;;  %s1506_s5 = inlined_call_operand.vmem [shape: f32[2,1,128,2], index: 5, kind: output, shape index: {}]  }
   0x1   :  { %s1222_s20 = smov 0  }
   0x2 LB: > { %s27_s21 = sadd.s32 1, %s1180_s19  ;;  %p1074_p0 = scmp.ge.s32.totalorder %s1184_s20, 1  ;;  %s1184_s20 = sphi %s1222_s20, %s15_s20   ;;  %s1180_s19 = sphi %s1220_s19, %s1508_s19   ;;  %s1176_s18 = sphi %s1218_s18, %s1507_s18  }
   0x3   : > { %p29_p1 = scmp.ge.s32.totalorder %s27_s21, 2  ;;  %p208_p2 = scmp.lt.s32.totalorder %s1184_s20, 3 }
   0x5   : > { %s1510_s21 = smov (%p29_p1, %s27_s21), 0  ;;  %p209_p3 = pnand %p1074_p0, %p208_p2 }
   0x6   : > { %p245_p4 = scmp.lt.s32.totalorder (!%p209_p3), %s1176_s18, 1  ;;  %v1186_v0 = vmov (!%p209_p3), 0.0   ;;  %v1187_v1 = vmov (!%p209_p3), 0   ;;  %v272_v2 = vld [vmem:[%s1503_s2] sm:$0xff] (!%p209_p3)  ;;  %v274_v3 = vld [vmem:[%s1503_s2 + $0x10] sm:$0xff] (!%p209_p3)  ;;  %v273_v4 = vld [vmem:[%s1503_s2 + $0x8] sm:$0xff] (!%p209_p3) }
   0x7   : > { %212 = sbr.rel (%p209_p3) target bundleno = 700 (0x2bc), region = 40  ;;  %416 = vmatprep.mubr.f32.mxu0 (!%p209_p3), %v1186_v0  ;;  %752 = vmatprep.mubr.f32.mxu1 (!%p209_p3), %v1186_v0  ;;  %v275_v5 = vld [vmem:[%s1503_s2 + $0x18] sm:$0xff] (!%p209_p3)  ;;  %vm347_vm0 = vcmask (!%p209_p3), 1043456   ;;  %v264_v8 = vld [vmem:[%s1502_s1] sm:$0xff] (!%p209_p3)  ;;  %vm322_vm1 = vcmask (!%p209_p3), 31744   ;;  %v277_v10 = vld [vmem:[%s1503_s2 + $0x28] sm:$0xff] (!%p209_p3) }
   0x8   : > { %1159 = vset.pattern.permute.xlu0 (!%p209_p3), %v1187_v1  ;;  %1160 = vset.pattern.permute.xlu1 (!%p209_p3), %v1187_v1  ;;  %v276_v9 = vld [vmem:[%s1503_s2 + $0x20] sm:$0xff] (!%p209_p3)  ;;  %v265_v11 = vld [vmem:[%s1502_s1 + $0x8] sm:$0xff] (!%p209_p3)  ;;  %v278_v12 = vld [vmem:[%s1503_s2 + $0x30] sm:$0xff] (!%p209_p3)  ;;  %vm609_vm2 = vcmask (!%p209_p3), 523264   ;;  %vm947_vm3 = vcmask (!%p209_p3), 7168   ;;  %vm964_vm4 = vcmask (!%p209_p3), 15360  }
   0x9   : > { %282 = vperm.xlu0 (!%p209_p3), %1159, %v272_v2   ;;  %292 = vperm.xlu1 (!%p209_p3), %1160, %v274_v3   ;;  %v279_v13 = vld [vmem:[%s1503_s2 + $0x38] sm:$0xff] (!%p209_p3)  ;;  %v266_v14 = vld [vmem:[%s1502_s1 + $0x10] sm:$0xff] (!%p209_p3)  ;;  %v513_v15 = vld [vmem:[%s1505_s4] sm:$0xff] (!%p209_p3) }
   0xa   : > { %v514_v16 = vld [vmem:[%s1505_s4 + $0x8] sm:$0xff] (!%p209_p3)  ;;  %v267_v17 = vld [vmem:[%s1502_s1 + $0x18] sm:$0xff] (!%p209_p3)  ;;  %v515_v18 = vld [vmem:[%s1505_s4 + $0x10] sm:$0xff] (!%p209_p3) }
   0xb   : > { %v516_v19 = vld [vmem:[%s1505_s4 + $0x18] sm:$0xff] (!%p209_p3)  ;;  %v268_v20 = vld [vmem:[%s1502_s1 + $0x20] sm:$0xff] (!%p209_p3)  ;;  %v518_v22 = vld [vmem:[%s1505_s4 + $0x28] sm:$0xff] (!%p209_p3) }
   0xc   : > { %v517_v21 = vld [vmem:[%s1505_s4 + $0x20] sm:$0xff] (!%p209_p3)  ;;  %v269_v23 = vld [vmem:[%s1502_s1 + $0x28] sm:$0xff] (!%p209_p3)  ;;  %v519_v24 = vld [vmem:[%s1505_s4 + $0x30] sm:$0xff] (!%p209_p3) }
   0xd   : > { %287 = vperm.xlu0 (!%p209_p3), %1159, %v273_v4   ;;  %297 = vperm.xlu1 (!%p209_p3), %1160, %v275_v5   ;;  %v520_v25 = vld [vmem:[%s1505_s4 + $0x38] sm:$0xff] (!%p209_p3)  ;;  %v270_v26 = vld [vmem:[%s1502_s1 + $0x30] sm:$0xff] (!%p209_p3)  ;;  %v521_v27 = vld [vmem:[%s1505_s4 + $0x40] sm:$0xff] (!%p209_p3) }
   0xe   : > { %s1512_s18 = smov (!%p245_p4, %s1176_s18), 1  ;;  %v522_v28 = vld [vmem:[%s1505_s4 + $0x48] sm:$0xff]  ;;  %v271_v29 = vld [vmem:[%s1502_s1 + $0x38] sm:$0xff]  ;;  %v523_v30 = vld [vmem:[%s1505_s4 + $0x50] sm:$0xff] }
   0xf   : > { %s1107_s26 = sshll.u32 %s1512_s18, 3  ;;  %v524_v31 = vld [vmem:[%s1505_s4 + $0x58] sm:$0xff]  ;;  %v525_v32 = vld [vmem:[%s1505_s4 + $0x60] sm:$0xff]  ;;  %v526_v33 = vld [vmem:[%s1505_s4 + $0x68] sm:$0xff]  ;;  %s1108_s13 = sshll.u32 %s1512_s18, 7 }
  0x10   : > { %s252_s29 = scalar_lea.vmem %s1501_s0, %s1107_s26  ;;  %v527_v34 = vld [vmem:[%s1505_s4 + $0x70] sm:$0xff]  ;;  %v528_v35 = vld [vmem:[%s1505_s4 + $0x78] sm:$0xff]  ;;  %s1442_s16 = scalar_lea.vmem %s1506_s5, %s1108_s13 }
  0x11   : > { %v263_v6 = vld [vmem:[%s252_s29] sm:$0xff]  ;;  %302 = vperm.xlu0 %1159, %v276_v9   ;;  %307 = vperm.xlu1 %1160, %v277_v10  }
  0x12   : > { %v321_v7 = vcombine.high %v263_v6, %v263_v6 }
  0x14   : > { %1079 = vmatprep.subr.msk.mxu0 %vm347_vm0, %v321_v7 }
  0x15   : > { %1080 = vmatpush1.msk.msra.mxu0 %vm347_vm0, %v263_v6  ;;  %312 = vperm.xlu0 %1159, %v278_v12  }
  0x16   : > { %1081 = vmatmul.mubr.msk.f32.vlgmr.msra.gmra.mrb[0].mxu0 %vm322_vm1, %v264_v8  ;;  %317 = vperm.xlu1 %1160, %v279_v13  }
  0x17   : > { %422 = vmatprep.mubr.f32.mxu0 %v1186_v0 }
  0x19   : > { %531 = vperm.xlu0 %1159, %v513_v15  }
  0x1a   : > { %1082 = vmatmul.mubr.msk.f32.gmra.mrb[2].mxu0 %vm322_vm1, %v265_v11  ;;  %536 = vperm.xlu1 %1160, %v514_v16  }
  0x1b   : > { %428 = vmatprep.mubr.f32.mxu0 %v1186_v0 }
  0x1d   : > { %541 = vperm.xlu0 %1159, %v515_v18  }
  0x1e   : > { %1083 = vmatmul.mubr.msk.f32.gmra.mrb[4].mxu0 %vm322_vm1, %v266_v14  ;;  %546 = vperm.xlu1 %1160, %v516_v19  }
  0x1f   : > { %434 = vmatprep.mubr.f32.mxu0 %v1186_v0 }
  0x21   : > { %551 = vperm.xlu0 %1159, %v517_v21  }
  0x22   : > { %1084 = vmatmul.mubr.msk.f32.gmra.mrb[6].mxu0 %vm322_vm1, %v267_v17  ;;  %556 = vperm.xlu1 %1160, %v518_v22  }
  0x23   : > { %440 = vmatprep.mubr.f32.mxu0 %v1186_v0 }
  0x25   : > { %561 = vperm.xlu0 %1159, %v519_v24  }
  0x26   : > { %1085 = vmatmul.mubr.msk.f32.gmra.mrb[8].mxu0 %vm322_vm1, %v268_v20  ;;  %566 = vperm.xlu1 %1160, %v520_v25  }
  0x27   : > { %446 = vmatprep.mubr.f32.mxu0 %v1186_v0 }
  0x29   : > { %571 = vperm.xlu0 %1159, %v521_v27  }
  0x2a   : > { %1086 = vmatmul.mubr.msk.f32.gmra.mrb[10].mxu0 %vm322_vm1, %v269_v23  ;;  %576 = vperm.xlu1 %1160, %v522_v28  }
  0x2b   : > { %452 = vmatprep.mubr.f32.mxu0 %v1186_v0 }
  0x2d   : > { %581 = vperm.xlu0 %1159, %v523_v30  }
  0x2e   : > { %1087 = vmatmul.mubr.msk.f32.gmra.mrb[12].mxu0 %vm322_vm1, %v270_v26  ;;  %586 = vperm.xlu1 %1160, %v524_v31  }
  0x2f   : > { %458 = vmatprep.mubr.f32.mxu0 %v1186_v0 }
  0x31   : > { %591 = vperm.xlu0 %1159, %v525_v32  }
  0x32   : > { %1088 = vmatmul.mubr.msk.f32.gmra.mrb[14].mxu0 %vm322_vm1, %v271_v29  ;;  %596 = vperm.xlu1 %1160, %v526_v33  }
  0x33   : > { %722 = vmatprep.mubr.f32.mxu0 %v1186_v0 }
  0x35   : > { %601 = vperm.xlu0 %1159, %v527_v34  }
  0x36   : > { %606 = vperm.xlu1 %1160, %v528_v35  }
  0x88   : > { %v283_v36 = vpop.permute.xlu0 %282  ;;  %v293_v46 = vpop.permute.xlu1 %292 }
  0x8c   : > { %v288_v41 = vpop.permute.xlu0 %287  ;;  %v298_v60 = vpop.permute.xlu1 %297 }
  0x90   : > { %v303_v6 = vpop.permute.xlu0 %302  ;;  %v308_v17 = vpop.permute.xlu1 %307 }
  0x94   : > { %v313_v26 = vpop.permute.xlu0 %312 }
  0xe9   : > { %v418_v37 = vpop.f32.mrb[0].mxu0 }
  0xea   : > { %v419_v38 = vadd.f32 %v418_v37, %v283_v36  ;;  %v420_v39 = vpop.f32.mrb[1].mxu0  ;;  %v318_v37 = vpop.permute.xlu1 %317 }
  0xeb   : > { %v421_v40 = vadd.f32 %v420_v39, %v283_v36 }
  0xec   : > { %v465_v43 = vmul.f32 0.2, %v419_v38 }
  0xed   : > { %v424_v42 = vpop.f32.mrb[2].mxu0  ;;  %v466_v47 = vmul.f32 0.2, %v421_v40 }
  0xee   : > { %v425_v44 = vadd.f32 %v424_v42, %v288_v41  ;;  %v426_v45 = vpop.f32.mrb[3].mxu0  ;;  %v481_v52 = vmax.f32 %v419_v38, %v465_v43 }
  0xef   : > { %v427_v48 = vadd.f32 %v426_v45, %v288_v41  ;;  %v482_v56 = vmax.f32 %v421_v40, %v466_v47 }
  0xf0   : > { %v467_v49 = vmul.f32 0.2, %v425_v44 }
  0xf1   : > { %v468_v50 = vmul.f32 0.2, %v427_v48  ;;  %v430_v51 = vpop.f32.mrb[4].mxu0 }
  0xf2   : > { %v483_v53 = vmax.f32 %v425_v44, %v467_v49  ;;  %v431_v54 = vadd.f32 %v430_v51, %v293_v46  ;;  %v432_v55 = vpop.f32.mrb[5].mxu0 }
  0xf3   : > { %v484_v57 = vmax.f32 %v427_v48, %v468_v50  ;;  %v433_v58 = vadd.f32 %v432_v55, %v293_v46  ;;  %v498_v55 = vld [vmem:[%s1504_s3 + $0x8] sm:$0xff] }
  0xf4   : > { %v1111_v59 = vpack.c.bf16 %v483_v53, %v481_v52  ;;  %v469_v63 = vmul.f32 0.2, %v431_v54  ;;  %v497_v53 = vld [vmem:[%s1504_s3] sm:$0xff] }
  0xf5   : > { %v436_v61 = vpop.f32.mrb[6].mxu0  ;;  %v1109_v62 = vpack.c.bf16 %v484_v57, %v482_v56  ;;  %v470_v3 = vmul.f32 0.2, %v433_v58  ;;  %v503_v56 = vld [vmem:[%s1504_s3 + $0x30] sm:$0xff] }
  0xf6   : > { %v437_v1 = vadd.f32 %v436_v61, %v298_v60  ;;  %v438_v2 = vpop.f32.mrb[7].mxu0  ;;  %v485_v9 = vmax.f32 %v431_v54, %v469_v63  ;;  %v502_v54 = vld [vmem:[%s1504_s3 + $0x28] sm:$0xff]  ;;  %v499_v57 = vld [vmem:[%s1504_s3 + $0x10] sm:$0xff]  ;;  %v501_v61 = vld [vmem:[%s1504_s3 + $0x20] sm:$0xff] }
  0xf7   : > { %v439_v4 = vadd.f32 %v438_v2, %v298_v60  ;;  %1110 = vmatprep.subr.bf16.mxu0 %v1109_v62  ;;  %1125 = vmatprep.subr.bf16.mxu1 %v1109_v62  ;;  %v486_v13 = vmax.f32 %v433_v58, %v470_v3  ;;  %v504_v58 = vld [vmem:[%s1504_s3 + $0x38] sm:$0xff]  ;;  %v505_v60 = vld [vmem:[%s1504_s3 + $0x40] sm:$0xff]  ;;  %v506_v62 = vld [vmem:[%s1504_s3 + $0x48] sm:$0xff] }
  0xf8   : > { %v471_v5 = vmul.f32 0.2, %v437_v1  ;;  %1112 = vmatpush1.bf16.msra.mxu0 %v1111_v59  ;;  %1129 = vmatpush1.bf16.msra.mxu1 %v1111_v59  ;;  %v500_v59 = vld [vmem:[%s1504_s3 + $0x18] sm:$0xff]  ;;  %v507_v63 = vld [vmem:[%s1504_s3 + $0x50] sm:$0xff]  ;;  %v509_v2 = vld [vmem:[%s1504_s3 + $0x60] sm:$0xff] }
  0xf9   : > { %v472_v7 = vmul.f32 0.2, %v439_v4  ;;  %v442_v8 = vpop.f32.mrb[8].mxu0  ;;  %v510_v3 = vld [vmem:[%s1504_s3 + $0x68] sm:$0xff] }
  0xfa   : > { %v487_v10 = vmax.f32 %v437_v1, %v471_v5  ;;  %v443_v11 = vadd.f32 %v442_v8, %v303_v6  ;;  %v444_v12 = vpop.f32.mrb[9].mxu0  ;;  %v508_v1 = vld [vmem:[%s1504_s3 + $0x58] sm:$0xff] }
  0xfb   : > { %v488_v14 = vmax.f32 %v439_v4, %v472_v7  ;;  %v445_v15 = vadd.f32 %v444_v12, %v303_v6  ;;  %v511_v4 = vld [vmem:[%s1504_s3 + $0x70] sm:$0xff]  ;;  %v512_v5 = vld [vmem:[%s1504_s3 + $0x78] sm:$0xff]  ;;  %v532_v6 = vpop.permute.xlu0 %531  ;;  %v537_v7 = vpop.permute.xlu1 %536 }
  0xfc   : > { %v1115_v16 = vpack.c.bf16 %v487_v10, %v485_v9  ;;  %v473_v20 = vmul.f32 0.2, %v443_v11 }
  0xfd   : > { %v448_v18 = vpop.f32.mrb[10].mxu0  ;;  %v1113_v19 = vpack.c.bf16 %v488_v14, %v486_v13  ;;  %v474_v23 = vmul.f32 0.2, %v445_v15 }
  0xfe   : > { %v449_v21 = vadd.f32 %v448_v18, %v308_v17  ;;  %v450_v22 = vpop.f32.mrb[11].mxu0  ;;  %v489_v29 = vmax.f32 %v443_v11, %v473_v20 }
  0xff   : > { %v451_v24 = vadd.f32 %v450_v22, %v308_v17  ;;  %1114 = vmatprep.subr.bf16.mxu0 %v1113_v19  ;;  %1126 = vmatprep.subr.bf16.mxu1 %v1113_v19  ;;  %v490_v33 = vmax.f32 %v445_v15, %v474_v23  ;;  %v542_v8 = vpop.permute.xlu0 %541  ;;  %v547_v9 = vpop.permute.xlu1 %546 }
 0x100   : > { %v475_v25 = vmul.f32 0.2, %v449_v21  ;;  %1116 = vmatpush1.bf16.msra.mxu0 %v1115_v16  ;;  %1130 = vmatpush1.bf16.msra.mxu1 %v1115_v16 }
 0x101   : > { %v476_v27 = vmul.f32 0.2, %v451_v24  ;;  %v454_v28 = vpop.f32.mrb[12].mxu0 }
 0x102   : > { %v491_v30 = vmax.f32 %v449_v21, %v475_v25  ;;  %v455_v31 = vadd.f32 %v454_v28, %v313_v26  ;;  %v456_v32 = vpop.f32.mrb[13].mxu0 }
 0x103   : > { %v492_v34 = vmax.f32 %v451_v24, %v476_v27  ;;  %v457_v35 = vadd.f32 %v456_v32, %v313_v26  ;;  %v1434_v10 = vpop.permute.xlu0 %551  ;;  %v557_v11 = vpop.permute.xlu1 %556 }
 0x104   : > { %v1119_v36 = vpack.c.bf16 %v491_v30, %v489_v29  ;;  %v477_v40 = vmul.f32 0.2, %v455_v31 }
 0x105   : > { %v460_v38 = vpop.f32.mrb[14].mxu0  ;;  %v1117_v39 = vpack.c.bf16 %v492_v34, %v490_v33  ;;  %v478_v43 = vmul.f32 0.2, %v457_v35 }
 0x106   : > { %v461_v41 = vadd.f32 %v460_v38, %v318_v37  ;;  %v462_v42 = vpop.f32.mrb[15].mxu0  ;;  %v493_v47 = vmax.f32 %v455_v31, %v477_v40 }
 0x107   : > { %v463_v44 = vadd.f32 %v462_v42, %v318_v37  ;;  %1118 = vmatprep.subr.bf16.mxu0 %v1117_v39  ;;  %1127 = vmatprep.subr.bf16.mxu1 %v1117_v39  ;;  %v494_v49 = vmax.f32 %v457_v35, %v478_v43  ;;  %v562_v19 = vpop.permute.xlu0 %561 }
 0x108   : > { %v479_v45 = vmul.f32 0.2, %v461_v41  ;;  %1120 = vmatpush1.bf16.msra.mxu0 %v1119_v36  ;;  %1131 = vmatpush1.bf16.msra.mxu1 %v1119_v36  ;;  %v567_v36 = vpop.permute.xlu1 %566 }
 0x109   : > { %v480_v46 = vmul.f32 0.2, %v463_v44 }
 0x10a   : > { %v495_v48 = vmax.f32 %v461_v41, %v479_v45 }
 0x10b   : > { %v496_v50 = vmax.f32 %v463_v44, %v480_v46 }
 0x10c   : > { %v1123_v51 = vpack.c.bf16 %v495_v48, %v493_v47 }
 0x10d   : > { %v1121_v52 = vpack.c.bf16 %v496_v50, %v494_v49 }
 0x10f   : > { %1122 = vmatprep.subr.bf16.mxu0 %v1121_v52  ;;  %1128 = vmatprep.subr.bf16.mxu1 %v1121_v52 }
 0x110   : > { %1124 = vmatpush1.bf16.msra.mxu0 %v1123_v51  ;;  %1132 = vmatpush1.bf16.msra.mxu1 %v1123_v51 }
 0x113   : > { %1089 = vmatmul.mubr.msk.f32.vlgmr.msra.gmra.mrb[16].mxu0 %vm609_vm2, %v497_v53  ;;  %1094 = vmatmul.mubr.msk.f32.vlgmr.msra.gmra.mrb[0].mxu1 %vm609_vm2, %v502_v54  ;;  %v572_v53 = vpop.permute.xlu0 %571 }
 0x114   : > { %728 = vmatprep.mubr.f32.mxu0 %v1186_v0  ;;  %758 = vmatprep.mubr.f32.mxu1 %v1186_v0 }
 0x117   : > { %1090 = vmatmul.mubr.msk.f32.gmra.mrb[18].mxu0 %vm609_vm2, %v498_v55  ;;  %1095 = vmatmul.mubr.msk.f32.gmra.mrb[2].mxu1 %vm609_vm2, %v503_v56 }
 0x118   : > { %734 = vmatprep.mubr.f32.mxu0 %v1186_v0  ;;  %764 = vmatprep.mubr.f32.mxu1 %v1186_v0 }
 0x11b   : > { %1091 = vmatmul.mubr.msk.f32.gmra.mrb[20].mxu0 %vm609_vm2, %v499_v57  ;;  %1096 = vmatmul.mubr.msk.f32.gmra.mrb[4].mxu1 %vm609_vm2, %v504_v58 }
 0x11c   : > { %740 = vmatprep.mubr.f32.mxu0 %v1186_v0  ;;  %770 = vmatprep.mubr.f32.mxu1 %v1186_v0 }
 0x11f   : > { %1092 = vmatmul.mubr.msk.f32.gmra.mrb[22].mxu0 %vm609_vm2, %v500_v59  ;;  %1097 = vmatmul.mubr.msk.f32.gmra.mrb[6].mxu1 %vm609_vm2, %v505_v60 }
 0x120   : > { %746 = vmatprep.mubr.f32.mxu0 %v1186_v0  ;;  %776 = vmatprep.mubr.f32.mxu1 %v1186_v0 }
 0x123   : > { %1093 = vmatmul.mubr.msk.f32.gmra.mrb[24].mxu0 %vm609_vm2, %v501_v61  ;;  %1098 = vmatmul.mubr.msk.f32.gmra.mrb[8].mxu1 %vm609_vm2, %v506_v62 }
 0x124   : > { %782 = vmatprep.mubr.f32.mxu1 %v1186_v0 }
 0x127   : > { %1099 = vmatmul.mubr.msk.f32.gmra.mrb[10].mxu1 %vm609_vm2, %v507_v63 }
 0x128   : > { %788 = vmatprep.mubr.f32.mxu1 %v1186_v0 }
 0x12b   : > { %1100 = vmatmul.mubr.msk.f32.gmra.mrb[12].mxu1 %vm609_vm2, %v508_v1 }
 0x12c   : > { %794 = vmatprep.mubr.f32.mxu1 %v1186_v0 }
 0x12f   : > { %1101 = vmatmul.mubr.msk.f32.gmra.mrb[14].mxu1 %vm609_vm2, %v509_v2 }
 0x130   : > { %800 = vmatprep.mubr.f32.mxu1 %v1186_v0 }
 0x133   : > { %1102 = vmatmul.mubr.msk.f32.gmra.mrb[16].mxu1 %vm609_vm2, %v510_v3 }
 0x134   : > { %806 = vmatprep.mubr.f32.mxu1 %v1186_v0 }
 0x137   : > { %1103 = vmatmul.mubr.msk.f32.gmra.mrb[18].mxu1 %vm609_vm2, %v511_v4 }
 0x138   : > { %812 = vmatprep.mubr.f32.mxu1 %v1186_v0 }
 0x13b   : > { %1104 = vmatmul.mubr.msk.f32.gmra.mrb[20].mxu1 %vm609_vm2, %v512_v5 }
 0x1e6   : > { %v724_v12 = vpop.f32.mrb[16].mxu0  ;;  %v754_v13 = vpop.f32.mrb[0].mxu1 }
 0x1e7   : > { %v725_v14 = vadd.f32 %v724_v12, %v532_v6  ;;  %v755_v15 = vadd.f32 %v754_v13, %v557_v11  ;;  %v726_v16 = vpop.f32.mrb[17].mxu0  ;;  %v756_v17 = vpop.f32.mrb[1].mxu1 }
 0x1e8   : > { %v727_v0 = vadd.f32 %v726_v16, %v532_v6  ;;  %v757_v18 = vadd.f32 %v756_v17, %v557_v11 }
 0x1e9   : > { %v867_v20 = vmul.f32 %v725_v14, %v725_v14  ;;  %v877_v21 = vmul.f32 %v755_v15, %v755_v15 }
 0x1ea   : > { %v868_v22 = vmul.f32 %v727_v0, %v727_v0  ;;  %v878_v23 = vmul.f32 %v757_v18, %v757_v18  ;;  %v730_v24 = vpop.f32.mrb[18].mxu0  ;;  %v760_v25 = vpop.f32.mrb[2].mxu1  ;;  %v819_v26 = vadd.f32 %v727_v0, %v725_v14  ;;  %v834_v27 = vadd.f32 %v757_v18, %v755_v15 }
 0x1eb   : > { %v731_v28 = vadd.f32 %v730_v24, %v537_v7  ;;  %v761_v29 = vadd.f32 %v760_v25, %v562_v19  ;;  %v732_v30 = vpop.f32.mrb[19].mxu0  ;;  %v762_v31 = vpop.f32.mrb[3].mxu1 }
 0x1ec   : > { %v733_v32 = vadd.f32 %v732_v30, %v537_v7  ;;  %v763_v33 = vadd.f32 %v762_v31, %v562_v19  ;;  %820 = vadd.xlane.f32.xlu0 %v819_v26  ;;  %v899_v34 = vadd.f32 %v868_v22, %v867_v20  ;;  %v914_v35 = vadd.f32 %v878_v23, %v877_v21  ;;  %v577_v7 = vpop.permute.xlu1 %576  ;;  %v582_v26 = vpop.permute.xlu0 %581 }
 0x1ed   : > { %v869_v37 = vmul.f32 %v731_v28, %v731_v28  ;;  %v879_v38 = vmul.f32 %v761_v29, %v761_v29 }
 0x1ee   : > { %v870_v39 = vmul.f32 %v733_v32, %v733_v32  ;;  %v880_v40 = vmul.f32 %v763_v33, %v763_v33  ;;  %v736_v41 = vpop.f32.mrb[20].mxu0  ;;  %v766_v42 = vpop.f32.mrb[4].mxu1  ;;  %900 = vadd.xlane.f32.xlu1 %v899_v34  ;;  %v822_v43 = vadd.f32 %v733_v32, %v731_v28  ;;  %v837_v44 = vadd.f32 %v763_v33, %v761_v29 }
 0x1ef   : > { %v737_v45 = vadd.f32 %v736_v41, %v542_v8  ;;  %v767_v46 = vadd.f32 %v766_v42, %v567_v36  ;;  %v738_v47 = vpop.f32.mrb[21].mxu0  ;;  %v768_v48 = vpop.f32.mrb[5].mxu1 }
 0x1f0   : > { %v739_v49 = vadd.f32 %v738_v47, %v542_v8  ;;  %v769_v50 = vadd.f32 %v768_v48, %v567_v36  ;;  %835 = vadd.xlane.f32.xlu0 %v834_v27  ;;  %v902_v51 = vadd.f32 %v870_v39, %v869_v37  ;;  %v917_v52 = vadd.f32 %v880_v40, %v879_v38  ;;  %v587_v37 = vpop.permute.xlu1 %586 }
 0x1f1   : > { %v871_v54 = vmul.f32 %v737_v45, %v737_v45  ;;  %v881_v55 = vmul.f32 %v767_v46, %v767_v46 }
 0x1f2   : > { %v872_v56 = vmul.f32 %v739_v49, %v739_v49  ;;  %v882_v57 = vmul.f32 %v769_v50, %v769_v50  ;;  %v742_v58 = vpop.f32.mrb[22].mxu0  ;;  %v772_v59 = vpop.f32.mrb[6].mxu1  ;;  %823 = vadd.xlane.f32.xlu1 %v822_v43  ;;  %v825_v60 = vadd.f32 %v739_v49, %v737_v45  ;;  %v840_v61 = vadd.f32 %v769_v50, %v767_v46 }
 0x1f3   : > { %v743_v62 = vadd.f32 %v742_v58, %v547_v9  ;;  %v773_v63 = vadd.f32 %v772_v59, %v572_v53  ;;  %v744_v1 = vpop.f32.mrb[23].mxu0  ;;  %v774_v2 = vpop.f32.mrb[7].mxu1 }
 0x1f4   : > { %v745_v3 = vadd.f32 %v744_v1, %v547_v9  ;;  %v775_v4 = vadd.f32 %v774_v2, %v572_v53  ;;  %915 = vadd.xlane.f32.xlu0 %v914_v35  ;;  %v905_v5 = vadd.f32 %v872_v56, %v871_v54  ;;  %v920_v6 = vadd.f32 %v882_v57, %v881_v55  ;;  %v592_v46 = vpop.permute.xlu0 %591  ;;  %v597_v55 = vpop.permute.xlu1 %596 }
 0x1f5   : > { %v873_v8 = vmul.f32 %v743_v62, %v743_v62  ;;  %v883_v11 = vmul.f32 %v773_v63, %v773_v63 }
 0x1f6   : > { %v874_v12 = vmul.f32 %v745_v3, %v745_v3  ;;  %v884_v13 = vmul.f32 %v775_v4, %v775_v4  ;;  %v748_v14 = vpop.f32.mrb[24].mxu0  ;;  %v778_v15 = vpop.f32.mrb[8].mxu1  ;;  %838 = vadd.xlane.f32.xlu1 %v837_v44  ;;  %v843_v16 = vadd.f32 %v775_v4, %v773_v63  ;;  %v828_v17 = vadd.f32 %v745_v3, %v743_v62 }
 0x1f7   : > { %v749_v0 = vadd.f32 %v748_v14, %v1434_v10  ;;  %v779_v18 = vadd.f32 %v778_v15, %v577_v7  ;;  %v750_v19 = vpop.f32.mrb[25].mxu0  ;;  %v780_v20 = vpop.f32.mrb[9].mxu1 }
 0x1f8   : > { %v751_v9 = vadd.f32 %v750_v19, %v1434_v10  ;;  %v781_v21 = vadd.f32 %v780_v20, %v577_v7  ;;  %903 = vadd.xlane.f32.xlu0 %v902_v51  ;;  %v923_v22 = vadd.f32 %v884_v13, %v883_v11  ;;  %v908_v23 = vadd.f32 %v874_v12, %v873_v8  ;;  %v602_v1 = vpop.permute.xlu0 %601  ;;  %v607_v12 = vpop.permute.xlu1 %606 }
 0x1f9   : > { %v875_v24 = vmul.f32 %v749_v0, %v749_v0  ;;  %v885_v25 = vmul.f32 %v779_v18, %v779_v18 }
 0x1fa   : > { %v876_v27 = vmul.f32 %v751_v9, %v751_v9  ;;  %v886_v28 = vmul.f32 %v781_v21, %v781_v21  ;;  %v784_v29 = vpop.f32.mrb[10].mxu1  ;;  %918 = vadd.xlane.f32.xlu1 %v917_v52  ;;  %v831_v30 = vadd.f32 %v751_v9, %v749_v0  ;;  %v846_v31 = vadd.f32 %v781_v21, %v779_v18 }
 0x1fb   : > { %v785_v32 = vadd.f32 %v784_v29, %v582_v26  ;;  %v786_v33 = vpop.f32.mrb[11].mxu1 }
 0x1fc   : > { %v787_v34 = vadd.f32 %v786_v33, %v582_v26  ;;  %826 = vadd.xlane.f32.xlu0 %v825_v60  ;;  %v911_v35 = vadd.f32 %v876_v27, %v875_v24  ;;  %v926_v36 = vadd.f32 %v886_v28, %v885_v25 }
 0x1fd   : > { %v887_v10 = vmul.f32 %v785_v32, %v785_v32 }
 0x1fe   : > { %v888_v38 = vmul.f32 %v787_v34, %v787_v34  ;;  %v790_v39 = vpop.f32.mrb[12].mxu1  ;;  %906 = vadd.xlane.f32.xlu1 %v905_v5  ;;  %v849_v40 = vadd.f32 %v787_v34, %v785_v32 }
 0x1ff   : > { %v791_v41 = vadd.f32 %v790_v39, %v587_v37  ;;  %v792_v42 = vpop.f32.mrb[13].mxu1 }
 0x200   : > { %v793_v43 = vadd.f32 %v792_v42, %v587_v37  ;;  %841 = vadd.xlane.f32.xlu0 %v840_v61  ;;  %v929_v44 = vadd.f32 %v888_v38, %v887_v10 }
 0x201   : > { %v889_v45 = vmul.f32 %v791_v41, %v791_v41 }
 0x202   : > { %v890_v47 = vmul.f32 %v793_v43, %v793_v43  ;;  %v796_v48 = vpop.f32.mrb[14].mxu1  ;;  %844 = vadd.xlane.f32.xlu1 %v843_v16  ;;  %v852_v49 = vadd.f32 %v793_v43, %v791_v41 }
 0x203   : > { %v797_v50 = vadd.f32 %v796_v48, %v592_v46  ;;  %v798_v51 = vpop.f32.mrb[15].mxu1 }
 0x204   : > { %v799_v52 = vadd.f32 %v798_v51, %v592_v46  ;;  %921 = vadd.xlane.f32.xlu0 %v920_v6  ;;  %v932_v53 = vadd.f32 %v890_v47, %v889_v45 }
 0x205   : > { %v891_v54 = vmul.f32 %v797_v50, %v797_v50 }
 0x206   : > { %v892_v56 = vmul.f32 %v799_v52, %v799_v52  ;;  %v802_v57 = vpop.f32.mrb[16].mxu1  ;;  %924 = vadd.xlane.f32.xlu1 %v923_v22  ;;  %v855_v58 = vadd.f32 %v799_v52, %v797_v50 }
 0x207   : > { %v803_v59 = vadd.f32 %v802_v57, %v597_v55  ;;  %v804_v60 = vpop.f32.mrb[17].mxu1 }
 0x208   : > { %v805_v61 = vadd.f32 %v804_v60, %v597_v55  ;;  %829 = vadd.xlane.f32.xlu0 %v828_v17  ;;  %v935_v62 = vadd.f32 %v892_v56, %v891_v54 }
 0x209   : > { %v893_v63 = vmul.f32 %v803_v59, %v803_v59 }
 0x20a   : > { %v894_v2 = vmul.f32 %v805_v61, %v805_v61  ;;  %v808_v3 = vpop.f32.mrb[18].mxu1  ;;  %832 = vadd.xlane.f32.xlu1 %v831_v30  ;;  %v858_v4 = vadd.f32 %v805_v61, %v803_v59 }
 0x20b   : > { %v809_v5 = vadd.f32 %v808_v3, %v602_v1  ;;  %v810_v6 = vpop.f32.mrb[19].mxu1 }
 0x20c   : > { %v811_v7 = vadd.f32 %v810_v6, %v602_v1  ;;  %909 = vadd.xlane.f32.xlu0 %v908_v23  ;;  %v938_v8 = vadd.f32 %v894_v2, %v893_v63 }
 0x20d   : > { %v895_v11 = vmul.f32 %v809_v5, %v809_v5 }
 0x20e   : > { %v896_v13 = vmul.f32 %v811_v7, %v811_v7  ;;  %v814_v14 = vpop.f32.mrb[20].mxu1  ;;  %912 = vadd.xlane.f32.xlu1 %v911_v35  ;;  %v861_v15 = vadd.f32 %v811_v7, %v809_v5 }
 0x20f   : > { %v815_v16 = vadd.f32 %v814_v14, %v607_v12  ;;  %v816_v17 = vpop.f32.mrb[21].mxu1 }
 0x210   : > { %v817_v0 = vadd.f32 %v816_v17, %v607_v12  ;;  %847 = vadd.xlane.f32.xlu0 %v846_v31  ;;  %v941_v18 = vadd.f32 %v896_v13, %v895_v11 }
 0x211   : > { %v897_v19 = vmul.f32 %v815_v16, %v815_v16 }
 0x212   : > { %v898_v20 = vmul.f32 %v817_v0, %v817_v0  ;;  %850 = vadd.xlane.f32.xlu1 %v849_v40  ;;  %v864_v9 = vadd.f32 %v817_v0, %v815_v16 }
 0x214   : > { %927 = vadd.xlane.f32.xlu0 %v926_v36  ;;  %v944_v21 = vadd.f32 %v898_v20, %v897_v19 }
 0x216   : > { %930 = vadd.xlane.f32.xlu1 %v929_v44 }
 0x218   : > { %853 = vadd.xlane.f32.xlu0 %v852_v49 }
 0x21a   : > { %856 = vadd.xlane.f32.xlu1 %v855_v58 }
 0x21c   : > { %933 = vadd.xlane.f32.xlu0 %v932_v53 }
 0x21e   : > { %936 = vadd.xlane.f32.xlu1 %v935_v62 }
 0x220   : > { %859 = vadd.xlane.f32.xlu0 %v858_v4 }
 0x222   : > { %862 = vadd.xlane.f32.xlu1 %v861_v15 }
 0x224   : > { %939 = vadd.xlane.f32.xlu0 %v938_v8 }
 0x226   : > { %942 = vadd.xlane.f32.xlu1 %v941_v18 }
 0x228   : > { %865 = vadd.xlane.f32.xlu0 %v864_v9 }
 0x22c   : > { %945 = vadd.xlane.f32.xlu0 %v944_v21 }
 0x279   : > { %v821_v22 = vpop.xlane.xlu0 %820 }
 0x27b   : > { %v901_v23 = vpop.xlane.xlu1 %900 }
 0x27c   : > { %v948_v24 = vsel %vm947_vm3, %v821_v22, %v901_v23 }
 0x27d   : > { %965 = vst.msk [vmem:[%s1442_s16] sm:$0xff] %vm964_vm4, %v948_v24  ;;  %v836_v25 = vpop.xlane.xlu0 %835 }
 0x27f   : > { %v824_v26 = vpop.xlane.xlu1 %823 }
 0x281   : > { %v916_v27 = vpop.xlane.xlu0 %915 }
 0x282   : > { %v953_v28 = vsel %vm947_vm3, %v836_v25, %v916_v27 }
 0x283   : > { %970 = vst.msk [vmem:[%s1442_s16 + $0x28] sm:$0xff] %vm964_vm4, %v953_v28  ;;  %v839_v29 = vpop.xlane.xlu1 %838 }
 0x285   : > { %v904_v30 = vpop.xlane.xlu0 %903 }
 0x286   : > { %v949_v31 = vsel %vm947_vm3, %v824_v26, %v904_v30 }
 0x287   : > { %966 = vst.msk [vmem:[%s1442_s16 + $0x8] sm:$0xff] %vm964_vm4, %v949_v31  ;;  %v919_v32 = vpop.xlane.xlu1 %918 }
 0x288   : > { %v954_v33 = vsel %vm947_vm3, %v839_v29, %v919_v32 }
 0x289   : > { %971 = vst.msk [vmem:[%s1442_s16 + $0x30] sm:$0xff] %vm964_vm4, %v954_v33  ;;  %v827_v34 = vpop.xlane.xlu0 %826 }
 0x28b   : > { %v907_v35 = vpop.xlane.xlu1 %906 }
 0x28c   : > { %v950_v36 = vsel %vm947_vm3, %v827_v34, %v907_v35 }
 0x28d   : > { %967 = vst.msk [vmem:[%s1442_s16 + $0x10] sm:$0xff] %vm964_vm4, %v950_v36  ;;  %v842_v10 = vpop.xlane.xlu0 %841 }
 0x28f   : > { %v845_v37 = vpop.xlane.xlu1 %844 }
 0x291   : > { %v922_v38 = vpop.xlane.xlu0 %921 }
 0x292   : > { %v955_v39 = vsel %vm947_vm3, %v842_v10, %v922_v38 }
 0x293   : > { %972 = vst.msk [vmem:[%s1442_s16 + $0x38] sm:$0xff] %vm964_vm4, %v955_v39  ;;  %v925_v40 = vpop.xlane.xlu1 %924 }
 0x294   : > { %v956_v41 = vsel %vm947_vm3, %v845_v37, %v925_v40 }
 0x295   : > { %973 = vst.msk [vmem:[%s1442_s16 + $0x40] sm:$0xff] %vm964_vm4, %v956_v41  ;;  %v830_v42 = vpop.xlane.xlu0 %829 }
 0x297   : > { %v833_v43 = vpop.xlane.xlu1 %832 }
 0x299   : > { %v910_v44 = vpop.xlane.xlu0 %909 }
 0x29a   : > { %v951_v45 = vsel %vm947_vm3, %v830_v42, %v910_v44 }
 0x29b   : > { %968 = vst.msk [vmem:[%s1442_s16 + $0x18] sm:$0xff] %vm964_vm4, %v951_v45  ;;  %v913_v46 = vpop.xlane.xlu1 %912 }
 0x29c   : > { %v952_v47 = vsel %vm947_vm3, %v833_v43, %v913_v46 }
 0x29d   : > { %969 = vst.msk [vmem:[%s1442_s16 + $0x20] sm:$0xff] %vm964_vm4, %v952_v47  ;;  %v848_v48 = vpop.xlane.xlu0 %847 }
 0x29f   : > { %v851_v49 = vpop.xlane.xlu1 %850 }
 0x2a1   : > { %v928_v50 = vpop.xlane.xlu0 %927 }
 0x2a2   : > { %v957_v51 = vsel %vm947_vm3, %v848_v48, %v928_v50 }
 0x2a3   : > { %974 = vst.msk [vmem:[%s1442_s16 + $0x48] sm:$0xff] %vm964_vm4, %v957_v51  ;;  %v931_v52 = vpop.xlane.xlu1 %930 }
 0x2a4   : > { %v958_v53 = vsel %vm947_vm3, %v851_v49, %v931_v52 }
 0x2a5   : > { %975 = vst.msk [vmem:[%s1442_s16 + $0x50] sm:$0xff] %vm964_vm4, %v958_v53  ;;  %v854_v54 = vpop.xlane.xlu0 %853 }
 0x2a7   : > { %v857_v55 = vpop.xlane.xlu1 %856 }
 0x2a9   : > { %v934_v56 = vpop.xlane.xlu0 %933 }
 0x2aa   : > { %v959_v57 = vsel %vm947_vm3, %v854_v54, %v934_v56 }
 0x2ab   : > { %976 = vst.msk [vmem:[%s1442_s16 + $0x58] sm:$0xff] %vm964_vm4, %v959_v57  ;;  %v937_v58 = vpop.xlane.xlu1 %936 }
 0x2ac   : > { %v960_v59 = vsel %vm947_vm3, %v857_v55, %v937_v58 }
 0x2ad   : > { %977 = vst.msk [vmem:[%s1442_s16 + $0x60] sm:$0xff] %vm964_vm4, %v960_v59  ;;  %v860_v60 = vpop.xlane.xlu0 %859 }
 0x2af   : > { %v863_v61 = vpop.xlane.xlu1 %862 }
 0x2b1   : > { %v940_v62 = vpop.xlane.xlu0 %939 }
 0x2b2   : > { %v961_v63 = vsel %vm947_vm3, %v860_v60, %v940_v62 }
 0x2b3   : > { %978 = vst.msk [vmem:[%s1442_s16 + $0x68] sm:$0xff] %vm964_vm4, %v961_v63  ;;  %v943_v1 = vpop.xlane.xlu1 %942 }
 0x2b4   : > { %v962_v2 = vsel %vm947_vm3, %v863_v61, %v943_v1 }
 0x2b5   : > { %979 = vst.msk [vmem:[%s1442_s16 + $0x70] sm:$0xff] %vm964_vm4, %v962_v2  ;;  %v866_v3 = vpop.xlane.xlu0 %865 }
 0x2b9   : > { %v946_v4 = vpop.xlane.xlu0 %945 }
 0x2ba   : > { %v963_v5 = vsel %vm947_vm3, %v866_v3, %v946_v4 }
 0x2bb   : > { %980 = vst.msk [vmem:[%s1442_s16 + $0x78] sm:$0xff] %vm964_vm4, %v963_v5 }
 0x2bc PF: > { %s15_s20 = sadd.s32 1, %s1184_s20   ;;  %s1507_s18 = smov %s1180_s19 }
 0x2bd   : > { %p12_p5 = scmp.ge.s32.totalorder %s15_s20, 4   ;;  %s1508_s19 = smov %s1510_s21 }
 0x2bf   :  { %14 = sbr.rel (!%p12_p5) target bundleno = 2 (0x2), region = 70 }

</bundles_post_ra>
